<compile_context>
chip_gen: v5e
topology: v5e:2x2
jax: 0.10.0
libtpu: 0.0.40
codegen_flags: <defaults>
</compile_context>

<pallas_src>
import jax
import jax.numpy as jnp
from jax.experimental import pallas as pl
from jax.experimental.pallas import tpu as pltpu


def _make_pad_kernel(H, W, p):
    Wo = W + 2 * p

    def kernel(x_ref, o_ref):
        xv = x_ref[...]                                               # (TB, H, W)
        # Circular pad along W (lane axis): cheap XLU lane shifts.
        xw = jnp.concatenate([xv[:, :, W - p:], xv, xv[:, :, :p]], axis=2)  # (TB, H, Wo)
        tb = o_ref.shape[0]
        zeros = jnp.zeros((tb, p, Wo), dtype=o_ref.dtype)
        # Write the three H-bands directly (no sublane-axis concatenate / no (Ho,Wo) temp).
        o_ref[:, :p, :] = zeros            # top zero band
        o_ref[:, H + p:, :] = zeros        # bottom zero band
        o_ref[:, p:H + p, :] = xw          # wrapped body

    return kernel


def _choose_tb(nc, bytes_per_plane,
               target_tile_bytes=1 << 20,     # ~1 MiB tiles amortize ~0.35us/step overhead
               vmem_budget_bytes=24 << 20):   # double-buffered in+out stays well under 64 MiB (v7x)
    tb = max(1, target_tile_bytes // max(bytes_per_plane, 1))
    tb = min(tb, max(1, vmem_budget_bytes // (2 * max(bytes_per_plane, 1))))
    tb = min(tb, nc)
    # Keep >=2 grid steps when possible so both v7x TensorCores get work.
    if nc >= 2:
        tb = min(tb, -(-nc // 2))
    return int(max(1, tb))


def periodic_pad2d(x, pad_width):
    """Pallas TPU implementation of PeriodicPad2d.forward (NCHW in/out)."""
    N, C, H, W = x.shape
    p = int(pad_width)
    if p == 0:
        return x
    assert p <= W, f"pad_width ({p}) must be <= W ({W}) for circular padding"
    Ho, Wo = H + 2 * p, W + 2 * p

    nc = N * C
    xf = x.reshape(nc, H, W)

    itemsize = jnp.dtype(x.dtype).itemsize
    bytes_per_plane = (H * W + Ho * Wo) * itemsize
    TB = _choose_tb(nc, bytes_per_plane)

    # Pad the leading axis so the grid divides evenly (no OOB on VMEM refs).
    n_blocks = -(-nc // TB)
    nc_pad = n_blocks * TB
    if nc_pad != nc:
        xf = jnp.concatenate(
            [xf, jnp.zeros((nc_pad - nc, H, W), dtype=xf.dtype)], axis=0)

    # TODO(synk): for production shapes with W << 128, a wrapper-side transpose to a
    # lane-dense last axis would avoid masked narrow-lane stores; not needed if W >= 128.
    out = pl.pallas_call(
        _make_pad_kernel(H, W, p),
        out_shape=jax.ShapeDtypeStruct((nc_pad, Ho, Wo), x.dtype),
        grid=(n_blocks,),
        in_specs=[pl.BlockSpec((TB, H, W), lambda i: (i, 0, 0))],
        out_specs=pl.BlockSpec((TB, Ho, Wo), lambda i: (i, 0, 0)),
        compiler_params=pltpu.CompilerParams(
            dimension_semantics=("parallel",),
            vmem_limit_bytes=48 << 20,
        ),
    )(xf)

    if nc_pad != nc:
        out = out[:nc]
    return out.reshape(N, C, Ho, Wo)


def _reference(x, p):
    # circular pad on W, zero pad on H (matches F.pad semantics of the module)
    xw = jnp.concatenate([x[..., :, -p:], x, x[..., :, :p]], axis=-1)
    return jnp.pad(xw, ((0, 0), (0, 0), (p, p), (0, 0)), mode="constant")


if __name__ == "__main__":
    key = jax.random.PRNGKey(0)
    N, C, H, W = 2, 4, 16, 16
    pad_width = 1

    x = jax.random.normal(key, (N, C, H, W), dtype=jnp.float32)

    out = periodic_pad2d(x, pad_width)
    out = jax.block_until_ready(out)

    ref = _reference(x, pad_width)
    assert out.shape == (N, C, H + 2 * pad_width, W + 2 * pad_width), out.shape
    assert jnp.allclose(out, ref), "mismatch vs reference"

    print("KERNEL_OK")
</pallas_src>

<mosaic_0001>
module attributes {stable_mosaic.version = 11 : i64} {
  func.func @kernel(%arg0: i32, %arg1: memref<4x16x16xf32, #tpu.memory_space<vmem>>, %arg2: memref<4x18x18xf32, #tpu.memory_space<vmem>>) attributes {dimension_semantics = [#tpu.dimension_semantics<parallel>], iteration_bounds = array<i64: 2>, scalar_prefetch = 0 : i64, scratch_operands = 0 : i64, tpu.core_type = #tpu.core_type<tc>, window_params = [{transform_indices = @transform_0, window_bounds = array<i64: 4, 16, 16>}, {transform_indices = @transform_1, window_bounds = array<i64: 4, 18, 18>}]} {
    %c0 = arith.constant 0 : index
    %c0_0 = arith.constant 0 : index
    %c0_1 = arith.constant 0 : index
    %0 = vector.load %arg1[%c0, %c0_0, %c0_1] : memref<4x16x16xf32, #tpu.memory_space<vmem>>, vector<4x16x16xf32>
    %1 = vector.extract_strided_slice %0 {offsets = [0, 0, 15], sizes = [4, 16, 1], strides = [1, 1, 1]} : vector<4x16x16xf32> to vector<4x16x1xf32>
    %2 = vector.extract_strided_slice %0 {offsets = [0, 0, 0], sizes = [4, 16, 1], strides = [1, 1, 1]} : vector<4x16x16xf32> to vector<4x16x1xf32>
    %3 = tpu.concatenate %1, %0, %2 in 2 : vector<4x16x1xf32>, vector<4x16x16xf32>, vector<4x16x1xf32> -> vector<4x16x18xf32>
    %cst = arith.constant 0.000000e+00 : f32
    %4 = vector.broadcast %cst : f32 to vector<4x1x18xf32>
    %c0_2 = arith.constant 0 : index
    %c0_3 = arith.constant 0 : index
    %c0_4 = arith.constant 0 : index
    %5 = vector.load %arg2[%c0_2, %c0_3, %c0_4] : memref<4x18x18xf32, #tpu.memory_space<vmem>>, vector<4x1x18xf32>
    tpu.vector_store %arg2[%c0_2, %c0_3, %c0_4], %4 {strides = array<i32>} : memref<4x18x18xf32, #tpu.memory_space<vmem>>, vector<4x1x18xf32>,
    %c0_5 = arith.constant 0 : index
    %c17 = arith.constant 17 : index
    %c0_6 = arith.constant 0 : index
    %6 = vector.load %arg2[%c0_5, %c17, %c0_6] : memref<4x18x18xf32, #tpu.memory_space<vmem>>, vector<4x1x18xf32>
    tpu.vector_store %arg2[%c0_5, %c17, %c0_6], %4 {strides = array<i32>} : memref<4x18x18xf32, #tpu.memory_space<vmem>>, vector<4x1x18xf32>,
    %c0_7 = arith.constant 0 : index
    %c1 = arith.constant 1 : index
    %c0_8 = arith.constant 0 : index
    %7 = vector.load %arg2[%c0_7, %c1, %c0_8] : memref<4x18x18xf32, #tpu.memory_space<vmem>>, vector<4x16x18xf32>
    tpu.vector_store %arg2[%c0_7, %c1, %c0_8], %3 {strides = array<i32>} : memref<4x18x18xf32, #tpu.memory_space<vmem>>, vector<4x16x18xf32>,
    return
  }
  func.func @transform_0(%arg0: i32) -> (i32, i32, i32) {
    %c0_i32 = arith.constant 0 : i32
    %c0_i32_0 = arith.constant 0 : i32
    %c0_i32_1 = arith.constant 0 : i32
    return %arg0, %c0_i32, %c0_i32_0 : i32, i32, i32
  }
  func.func @transform_1(%arg0: i32) -> (i32, i32, i32) {
    %c0_i32 = arith.constant 0 : i32
    %c0_i32_0 = arith.constant 0 : i32
    %c0_i32_1 = arith.constant 0 : i32
    return %arg0, %c0_i32, %c0_i32_0 : i32, i32, i32
  }
}

</mosaic_0001>

<bundles_post_ra>
// kernel: tpu_custom_call.1
= control target key start
LH: loop header
LB: loop body
LE: loop exit
PB: predicated region body
PF: predicated region fallthrough
CT: control target
= control target key end

     0   :  { %6 = vsyncpa [#allocation3], 0  ;;  %s614_s0 = inlined_call_operand.hbm [shape: f32[8,16,16], index: 0, kind: input, shape index: {}]   ;;  %s615_s1 = inlined_call_operand.vmem [shape: f32[8,18,18], index: 1, kind: output, shape index: {}]  }
   0x1   :  { %8 = vsyncpa [#allocation3 + $0x1], 0  ;;  %s481_s6 = smov 0   ;;  %s483_s7 = smov 0  }
   0x2   :  { %s485_s8 = smov 0   ;;  %s487_s9 = smov 0  }
   0x3 LB: > { %s337_s10 = sadd.s32 4294967295, %s463_s9   ;;  %s501_s11 = sadd.s32 1, %s463_s9   ;;  %s463_s9 = sphi %s487_s9, %s622_s9   ;;  %s459_s8 = sphi %s485_s8, %s621_s8   ;;  %s455_s7 = sphi %s483_s7, %s620_s7   ;;  %s451_s6 = sphi %s481_s6, %s619_s6  }
   0x4   : > { %s18_s12 = ssub.s32 %s463_s9, %s501_s11  ;;  %s21_s13 = sadd.s32 1, %s459_s8 }
   0x5   : > { %p19_p0 = scmp.eq.s32.totalorder %s18_s12, 0  ;;  %p28_p1 = scmp.ne.s32.totalorder %s459_s8, %s455_s7 }
   0x6   : > { %p29_p2 = scmp.eq.s32.totalorder %s463_s9, 0  ;;  %p34_p3 = scmp.ne.s32.totalorder %s455_s7, %s451_s6 }
   0x7   : > { %s511_s14 = scalar_select %p19_p0, %s459_s8, %s21_s13  }
   0x8   : > { %p513_p4 = por %p29_p2, %p28_p1  ;;  %p35_p5 = scmp.eq.s32.totalorder %s337_s10, 0 }
   0x9   : > { %p360_p6 = scmp.lt.s32.totalorder %s463_s9, 2  ;;  %s84_s17 = sand.u32 1, %s459_s8  }
   0xa   : > { %p520_p7 = por %p35_p5, %p34_p3  ;;  %s341_s18 = sshll.u32 %s84_s17, 6 }
   0xb   : > { %s352_s19 = sshll.u32 %s463_s9, 6  ;;  %s88_s23 = scalar_lea.vmem [#allocation2], %s341_s18 }
   0xc   : > { %s94_s22 = scalar_lea.hbm %s614_s0, %s352_s19  ;;  %s97_s24 = sshll.u32 %s88_s23, 4  ;;  %s98_s24 = int_to_ptr.vmem [resolvable:$true] %s97_s24 }
   0xd   : > { %s95_s25 = sshll.u32 %s94_s22, 4  ;;  %p531_p8 = pnand %p360_p6, %p513_p4  ;;  %s96_s25 = int_to_ptr.hbm [resolvable:$true] %s95_s25 }
   0xe   : > { %p345_p9 = scmp.ge.s32.totalorder %s463_s9, 1  ;;  %s85_s27 = scalar_lea.sflag [#allocation3], %s84_s17 }
   0xf   : > { %s399_s28 = sshra.s32 %s96_s25, 4  ;;  %p403_p11 = pneg %p531_p8  ;;  %s400_s28 = int_to_ptr.hbm [resolvable:$true] %s399_s28 }
  0x10   : > { %s401_s29 = scalar_lea.hbm %s400_s28, 64  ;;  %s406_s3 = scalar_lea.hbm %s614_s0, 128 }
  0x11   : > { %p402_p10 = scmp.ne.s32.totalorder %s400_s28, %s401_s29  ;;  %p407_p0 = scmp.lt.s32.totalorder %s400_s28, %s614_s0 }
  0x12   : > { %p408_p1 = scmp.lt.s32.totalorder %s406_s3, %s401_s29 }
  0x13   : > { %p404_p12 = pnand %p403_p11, %p402_p10 }
  0x14   : > { %p409_p2 = por %p408_p1, %p407_p0 }
  0x15   : > { %p405_p13 = pneg %p404_p12 }
  0x17   : > { %p410_p3 = pnand %p409_p2, %p405_p13 }
  0x19   : > { %413 = shalt.err (!%p410_p3)
}
  0x1a   : > { %s465_s6 = smov 128   ;;  %s466_s12 = smov 8  }
  0x1b   : > { %359 = dma.hbm_to_vmem [thread:$0]  (!%p531_p8), %s96_s25, 1024, %s98_s24, %s85_s27, %s465_s6, %s465_s6, %s466_s12  }
  0x1c   : > { %p105_p4 = scmp.lt.s32.totalorder %s463_s9, 3 }
  0x1e   : > { %p106_p5 = pnand %p345_p9, %p105_p4 }
  0x1f   : > { %s111_s13 = sand.u32 (!%p106_p5), 1, %s455_s7  }
  0x20   : > { %109 = sbr.rel (%p106_p5) target bundleno = 213 (0xd5), region = 24  ;;  %s346_s15 = sshll.u32 (!%p106_p5), %s111_s13, 6 }
  0x21   : > { %s112_s17 = scalar_lea.sflag (!%p106_p5), [#allocation3], %s111_s13  ;;  %s115_s18 = scalar_lea.vmem (!%p106_p5), [#allocation2], %s346_s15 }
  0x25   : > { %446 = dma.done.wait (%p520_p7), %s112_s17, 1024  }
  0x26   : > { %448 = vsyncadd (%p520_p7), %s112_s17, 4294966272  ;;  %v148_v0 = vld [vmem:[%s115_s18 + $0x20] sm:$0xff]  ;;  %v146_v1 = vld [vmem:[%s115_s18 + $0x10] sm:$0xff]  ;;  %s467_s19 = smov 113   ;;  %s468_s20 = smov 1   ;;  %vm250_vm0 = vcmask 139264  }
  0x27   : > { %v144_v2 = vld [vmem:[%s115_s18] sm:$0xff]  ;;  %168 = vrot.lane.b32.xlu2 %v148_v0, %s467_s19  ;;  %164 = vrot.lane.b32.xlu1 %v146_v1, %s467_s19  ;;  %v149_v3 = vld [vmem:[%s115_s18 + $0x28] sm:$0xff]  ;;  %s469_s16 = smov 17   ;;  %s347_s21 = sshll.u32 %s337_s10, 2  ;;  %v470_v10 = vmov 0.0   ;;  %vm232_vm1 = vcmask 7168  }
  0x28   : > { %160 = vrot.lane.b32.xlu0 %v144_v2, %s467_s19  ;;  %v147_v4 = vld [vmem:[%s115_s18 + $0x18] sm:$0xff]  ;;  %v145_v5 = vld [vmem:[%s115_s18 + $0x8] sm:$0xff]  ;;  %v150_v7 = vld [vmem:[%s115_s18 + $0x30] sm:$0xff]  ;;  %p138_p6 = scmp.lt.s32.totalorder %s347_s21, 7  ;;  %vm241_vm2 = vcmask 138240   ;;  %vm259_vm3 = vcmask 146432  }
  0x29   : > { %v151_v6 = vld [vmem:[%s115_s18 + $0x38] sm:$0xff] }
  0x2a   : > { %s624_s21 = smov (!%p138_p6, %s347_s21), 7 }
  0x2b   : > { %s353_s22 = smul.u32 24, %s624_s21 }
  0x2d   : > { %s559_s25 = scalar_lea.vmem %s615_s1, %s353_s22 }
  0x2e   : > { %251 = vst.msk [vmem:[%s559_s25] sm:$0x1] %vm250_vm0, %v470_v10 }
  0x2f   : > { %170 = vrot.lane.b32.xlu2 %v149_v3, %s467_s19  ;;  %166 = vrot.lane.b32.xlu1 %v147_v4, %s467_s19  ;;  %252 = vst.msk [vmem:[%s559_s25 + $0x18] sm:$0x1] %vm250_vm0, %v470_v10 }
  0x30   : > { %162 = vrot.lane.b32.xlu0 %v145_v5, %s467_s19  ;;  %253 = vst.msk [vmem:[%s559_s25 + $0x30] sm:$0x1] %vm250_vm0, %v470_v10 }
  0x31   : > { %254 = vst.msk [vmem:[%s559_s25 + $0x48] sm:$0x1] %vm250_vm0, %v470_v10 }
  0x32   : > { %255 = vst.msk [vmem:[%s559_s25 + $0x11] sm:$0x1] %vm250_vm0, %v470_v10 }
  0x33   : > { %256 = vst.msk [vmem:[%s559_s25 + $0x29] sm:$0x1] %vm250_vm0, %v470_v10 }
  0x34   : > { %257 = vst.msk [vmem:[%s559_s25 + $0x41] sm:$0x1] %vm250_vm0, %v470_v10 }
  0x35   : > { %258 = vst.msk [vmem:[%s559_s25 + $0x59] sm:$0x1] %vm250_vm0, %v470_v10 }
  0x37   : > { %174 = vrot.lane.b32.xlu1 %v151_v6, %s467_s19  ;;  %184 = vrot.lane.b32.xlu2 %v144_v2, %s468_s20 }
  0x38   : > { %172 = vrot.lane.b32.xlu0 %v150_v7, %s467_s19 }
  0x3f   : > { %188 = vrot.lane.b32.xlu1 %v146_v1, %s468_s20  ;;  %190 = vrot.lane.b32.xlu2 %v147_v4, %s468_s20 }
  0x40   : > { %186 = vrot.lane.b32.xlu0 %v145_v5, %s468_s20 }
  0x47   : > { %210 = vrot.lane.b32.xlu1 %v145_v5, %s469_s16  ;;  %192 = vrot.lane.b32.xlu2 %v148_v0, %s468_s20 }
  0x48   : > { %208 = vrot.lane.b32.xlu0 %v144_v2, %s469_s16 }
  0x4f   : > { %212 = vrot.lane.b32.xlu1 %v146_v1, %s469_s16  ;;  %214 = vrot.lane.b32.xlu2 %v147_v4, %s469_s16 }
  0x50   : > { %194 = vrot.lane.b32.xlu0 %v149_v3, %s468_s20 }
  0x57   : > { %198 = vrot.lane.b32.xlu1 %v151_v6, %s468_s20  ;;  %216 = vrot.lane.b32.xlu2 %v148_v0, %s469_s16 }
  0x58   : > { %196 = vrot.lane.b32.xlu0 %v150_v7, %s468_s20 }
  0x5f   : > { %220 = vrot.lane.b32.xlu1 %v150_v7, %s469_s16  ;;  %222 = vrot.lane.b32.xlu2 %v151_v6, %s469_s16 }
  0x60   : > { %218 = vrot.lane.b32.xlu0 %v149_v3, %s469_s16 }
  0x81   : > { %v169_v8 = vpop.permute.xlu2 %168 }
  0x89   : > { %v171_v9 = vpop.permute.xlu2 %170 }
  0x91   : > { %v185_v11 = vpop.permute.xlu2 %184 }
  0x99   : > { %v165_v12 = vpop.permute.xlu1 %164  ;;  %v191_v15 = vpop.permute.xlu2 %190 }
  0x9a   : > { %v161_v13 = vpop.permute.xlu0 %160 }
  0x9b   : > { %v233_v25 = vsel %vm232_vm1, %v161_v13, %v185_v11 }
  0xa1   : > { %v167_v14 = vpop.permute.xlu1 %166  ;;  %v193_v19 = vpop.permute.xlu2 %192 }
  0xa2   : > { %v163_v16 = vpop.permute.xlu0 %162  ;;  %v236_v26 = vsel %vm232_vm1, %v167_v14, %v191_v15  ;;  %v237_v34 = vsel %vm232_vm1, %v169_v8, %v193_v19 }
  0xa9   : > { %v175_v17 = vpop.permute.xlu1 %174  ;;  %v215_v22 = vpop.permute.xlu2 %214 }
  0xaa   : > { %v173_v18 = vpop.permute.xlu0 %172  ;;  %v245_v29 = vsel %vm241_vm2, %v236_v26, %v215_v22 }
  0xab   : > { %263 = vst.msk [vmem:[%s559_s25 + $0x21] sm:$0xff] %vm259_vm3, %v245_v29 }
  0xb1   : > { %v189_v20 = vpop.permute.xlu1 %188  ;;  %v217_v31 = vpop.permute.xlu2 %216 }
  0xb2   : > { %v187_v21 = vpop.permute.xlu0 %186  ;;  %v235_v32 = vsel %vm232_vm1, %v165_v12, %v189_v20  ;;  %v246_v37 = vsel %vm241_vm2, %v237_v34, %v217_v31 }
  0xb3   : > { %v234_v23 = vsel %vm232_vm1, %v163_v16, %v187_v21  ;;  %264 = vst.msk [vmem:[%s559_s25 + $0x31] sm:$0xff] %vm259_vm3, %v246_v37 }
  0xb9   : > { %v211_v24 = vpop.permute.xlu1 %210  ;;  %v223_v42 = vpop.permute.xlu2 %222 }
  0xba   : > { %v243_v27 = vsel %vm241_vm2, %v234_v23, %v211_v24  ;;  %v209_v28 = vpop.permute.xlu0 %208 }
  0xbb   : > { %261 = vst.msk [vmem:[%s559_s25 + $0x9] sm:$0xff] %vm259_vm3, %v243_v27  ;;  %v242_v30 = vsel %vm241_vm2, %v233_v25, %v209_v28 }
  0xbc   : > { %260 = vst.msk [vmem:[%s559_s25 + $0x1] sm:$0xff] %vm259_vm3, %v242_v30 }
  0xc1   : > { %v213_v33 = vpop.permute.xlu1 %212 }
  0xc2   : > { %v244_v35 = vsel %vm241_vm2, %v235_v32, %v213_v33  ;;  %v195_v36 = vpop.permute.xlu0 %194 }
  0xc3   : > { %262 = vst.msk [vmem:[%s559_s25 + $0x19] sm:$0xff] %vm259_vm3, %v244_v35  ;;  %v238_v44 = vsel %vm232_vm1, %v171_v9, %v195_v36 }
  0xc9   : > { %v199_v38 = vpop.permute.xlu1 %198 }
  0xca   : > { %v197_v39 = vpop.permute.xlu0 %196  ;;  %v240_v40 = vsel %vm232_vm1, %v175_v17, %v199_v38 }
  0xcb   : > { %v239_v41 = vsel %vm232_vm1, %v173_v18, %v197_v39  ;;  %v249_v48 = vsel %vm241_vm2, %v240_v40, %v223_v42 }
  0xcc   : > { %267 = vst.msk [vmem:[%s559_s25 + $0x51] sm:$0xff] %vm259_vm3, %v249_v48 }
  0xd1   : > { %v221_v43 = vpop.permute.xlu1 %220 }
  0xd2   : > { %v248_v45 = vsel %vm241_vm2, %v239_v41, %v221_v43  ;;  %v219_v46 = vpop.permute.xlu0 %218 }
  0xd3   : > { %266 = vst.msk [vmem:[%s559_s25 + $0x49] sm:$0xff] %vm259_vm3, %v248_v45  ;;  %v247_v47 = vsel %vm241_vm2, %v238_v44, %v219_v46 }
  0xd4   : > { %265 = vst.msk [vmem:[%s559_s25 + $0x39] sm:$0xff] %vm259_vm3, %v247_v47 }
  0xd5 PF: > { %p11_p7 = scmp.ge.s32.totalorder %s501_s11, 4   ;;  %s619_s6 = smov %s455_s7 }
  0xd6   : > { %s620_s7 = smov %s459_s8  ;;  %s621_s8 = smov %s511_s14 }
  0xd7   : > { %s622_s9 = smov %s501_s11  ;;  %13 = sbr.rel (!%p11_p7) target bundleno = 3 (0x3), region = 64 }
  0xdc   :  { %292 = vsyncpa [#allocation3], 1 }
  0xdd   :  { %294 = vsyncpa [#allocation3 + $0x1], 1 }

</bundles_post_ra>
